<compile_context>
chip_gen: v7x
topology: tpu7x:2x2x1
jax: 0.10.0
libtpu: 0.0.40
codegen_flags: <defaults>
</compile_context>

<pallas_src>
import functools

import jax
import jax.numpy as jnp
from jax.experimental import pallas as pl
from jax.experimental.pallas import tpu as pltpu


def skipgram_loss_kernel(inpt_ref, idx_ref, emb_w_ref, ffw_w_ref, out_ref, emb_scratch,
                         *, num_pos):
    # inpt_ref:   (B,) int32 in SMEM          -- center-word ids
    # idx_ref:    (B, K, 1) int32 in VMEM     -- [trgs | rand] concatenated, K = C + R
    # emb_w_ref:  (VOC, E) f32 in VMEM        -- embedding table
    # ffw_w_ref:  (VOC_PAD, E) f32 in VMEM    -- linear table, zero-padded to 128 lanes
    # out_ref:    (1, 1) f32 in SMEM          -- scalar loss
    # emb_scratch:(B, E) f32 VMEM scratch     -- gathered center embeddings
    B, E = emb_scratch.shape
    K = idx_ref.shape[1]
    VOC_PAD = ffw_w_ref.shape[0]
    C = num_pos
    R = K - C
    f32 = jnp.float32

    # ---- Exact embedding gather via dynamic row slices (no MXU, bit-exact) ------------
    for b in range(B):  # B is small and static
        row = inpt_ref[b]
        emb_scratch[pl.ds(b, 1), :] = emb_w_ref[pl.ds(row, 1), :]
    emb = emb_scratch[...]                                                   # (B, E)

    # ---- Logits against every (padded) vocab row: single HIGHEST-precision matmul -----
    logits = jax.lax.dot_general(
        emb, ffw_w_ref[...], (((1,), (1,)), ((), ())),
        precision=jax.lax.Precision.HIGHEST,
        preferred_element_type=f32)                                          # (B, VOC_PAD)

    # ---- Merged positive+negative selection: one iota, one mask, one lane-reduce ------
    idx = idx_ref[...]                                                       # (B, K, 1)
    voc_iota = jax.lax.broadcasted_iota(jnp.int32, (B, K, VOC_PAD), 2)
    mask = jnp.where(voc_iota == idx, f32(1.0), f32(0.0))                    # (B, K, VOC_PAD)
    sel = jnp.sum(mask * logits[:, None, :], axis=-1)                        # (B, K)

    # ---- Single fused reduce for both loss terms ---------------------------------------
    # Columns < C are positives: -log(sigmoid(x)) via the stable softplus identity.
    # Columns >= C are negatives: literal -log(1 - sigmoid(x) + 1e-3) for PyTorch parity.
    pos_nll = jnp.maximum(-sel, 0.0) + jnp.log(1.0 + jnp.exp(-jnp.abs(sel)))
    neg_nll = -jnp.log(1.0 - jax.nn.sigmoid(sel) + 1e-3)
    col = jax.lax.broadcasted_iota(jnp.int32, (B, K), 1)
    per_elem = jnp.where(col < C,
                         pos_nll * f32(1.0 / (B * C)),
                         neg_nll * f32(1.0 / (B * R)))
    out_ref[0, 0] = jnp.sum(per_elem)


def skipgram_foo_forward(emb_weight, ffw_weight, inpt, trgs, rand):
    """Full module forward as ONE fused pallas_call (gathers + logits + loss)."""
    VOC, E = emb_weight.shape
    B = inpt.shape[0]
    C = trgs.shape[1]
    R = rand.shape[1]
    K = C + R
    VOC_PAD = ((VOC + 127) // 128) * 128  # lane-dense last dim for the logits matmul

    # Zero-pad the ffw table so padded rows yield exactly-zero logits (never selected
    # anyway since all indices are < VOC).
    ffw_pad = jnp.zeros((VOC_PAD, E), jnp.float32).at[:VOC, :].set(
        ffw_weight.astype(jnp.float32))

    # Concatenate positive + negative indices into one (B, K, 1) tensor -> one in-kernel pass.
    idx = jnp.concatenate(
        [trgs.astype(jnp.int32), rand.astype(jnp.int32)], axis=1).reshape(B, K, 1)

    kernel = functools.partial(skipgram_loss_kernel, num_pos=C)

    cost = pl.CostEstimate(
        flops=2 * B * E * VOC_PAD + 2 * B * K * VOC_PAD,
        transcendentals=3 * B * K,
        bytes_accessed=(VOC * E + VOC_PAD * E) * 4 + (B * K + B) * 4 + 4,
    )

    out = pl.pallas_call(
        kernel,
        out_shape=jax.ShapeDtypeStruct((1, 1), jnp.float32),
        in_specs=[
            pl.BlockSpec(memory_space=pltpu.MemorySpace.SMEM),   # inpt (B,) int32
            pl.BlockSpec(memory_space=pltpu.MemorySpace.VMEM),   # idx  (B, K, 1) int32
            pl.BlockSpec(memory_space=pltpu.MemorySpace.VMEM),   # emb_weight (VOC, E) f32
            pl.BlockSpec(memory_space=pltpu.MemorySpace.VMEM),   # ffw_weight (VOC_PAD, E) f32
        ],
        out_specs=pl.BlockSpec(memory_space=pltpu.MemorySpace.SMEM),
        scratch_shapes=[pltpu.VMEM((B, E), jnp.float32)],
        cost_estimate=cost,
    )(
        inpt.astype(jnp.int32),
        idx,
        emb_weight.astype(jnp.float32),
        ffw_pad,
    )
    return out[0, 0]


def _reference_loss(emb_weight, ffw_weight, inpt, trgs, rand):
    # Literal translation of the PyTorch forward (parity reference).
    emb = emb_weight[inpt]                                   # (B, E)
    ctx = ffw_weight[trgs]                                   # (B, C, E)
    rnd = ffw_weight[rand]                                   # (B, R, E)
    hi = jax.lax.Precision.HIGHEST
    out = jnp.einsum("bce,be->bc", ctx, emb, precision=hi)
    neg = jnp.einsum("bre,be->br", rnd, emb, precision=hi)
    out = jax.nn.sigmoid(out)
    neg = jax.nn.sigmoid(neg)
    pst = -jnp.mean(jnp.log(out))
    ngt = -jnp.mean(jnp.log(1.0 - neg + 1e-3))
    return pst + ngt


if __name__ == "__main__":
    # Module hyper-parameters (small, consistent with SkipGramFoo(voc, emb, _)).
    VOC, EMB = 64, 32
    B, C, R = 8, 4, 4  # batch, context targets per example, negative samples per example

    key = jax.random.PRNGKey(0)
    k_emb, k_ffw, k_in, k_tr, k_rd = jax.random.split(key, 5)

    # Deterministic parameter init mimicking torch defaults:
    #   Embedding.weight ~ N(0, 1); Linear.weight ~ U(-1/sqrt(in), 1/sqrt(in)).
    emb_weight = jax.random.normal(k_emb, (VOC, EMB), dtype=jnp.float32)
    bound = 1.0 / jnp.sqrt(jnp.float32(EMB))
    ffw_weight = jax.random.uniform(
        k_ffw, (VOC, EMB), dtype=jnp.float32, minval=-bound, maxval=bound
    )

    inpt = jax.random.randint(k_in, (B,), 0, VOC, dtype=jnp.int32)
    trgs = jax.random.randint(k_tr, (B, C), 0, VOC, dtype=jnp.int32)
    rand = jax.random.randint(k_rd, (B, R), 0, VOC, dtype=jnp.int32)

    loss = skipgram_foo_forward(emb_weight, ffw_weight, inpt, trgs, rand)
    loss = jax.block_until_ready(loss)

    ref = _reference_loss(emb_weight, ffw_weight, inpt, trgs, rand)
    assert jnp.allclose(loss, ref, atol=1e-5, rtol=1e-5), (loss, ref)

    print("KERNEL_OK")
</pallas_src>

<mosaic_0001>
module attributes {stable_mosaic.version = 11 : i64} {
  func.func @skipgram_loss_kernel(%arg0: memref<8xi32, #tpu.memory_space<smem>>, %arg1: memref<8x8x1xi32, #tpu.memory_space<vmem>>, %arg2: memref<64x32xf32, #tpu.memory_space<vmem>>, %arg3: memref<128x32xf32, #tpu.memory_space<vmem>>, %arg4: memref<1x1xf32, #tpu.memory_space<smem>>, %arg5: memref<8x32xf32, #tpu.memory_space<vmem>>) attributes {dimension_semantics = [], scalar_prefetch = 0 : i64, scratch_operands = 1 : i64, tpu.core_type = #tpu.core_type<tc>} {
    %c0 = arith.constant 0 : index
    %0 = memref.load %arg0[%c0] : memref<8xi32, #tpu.memory_space<smem>>
    %1 = arith.index_cast %0 : i32 to index
    %c0_0 = arith.constant 0 : index
    %2 = vector.load %arg2[%1, %c0_0] : memref<64x32xf32, #tpu.memory_space<vmem>>, vector<1x32xf32>
    %c0_1 = arith.constant 0 : index
    %c0_2 = arith.constant 0 : index
    %3 = vector.load %arg5[%c0_1, %c0_2] : memref<8x32xf32, #tpu.memory_space<vmem>>, vector<1x32xf32>
    tpu.vector_store %arg5[%c0_1, %c0_2], %2 {strides = array<i32>} : memref<8x32xf32, #tpu.memory_space<vmem>>, vector<1x32xf32>,
    %c1 = arith.constant 1 : index
    %4 = memref.load %arg0[%c1] : memref<8xi32, #tpu.memory_space<smem>>
    %5 = arith.index_cast %4 : i32 to index
    %c0_3 = arith.constant 0 : index
    %6 = vector.load %arg2[%5, %c0_3] : memref<64x32xf32, #tpu.memory_space<vmem>>, vector<1x32xf32>
    %c1_4 = arith.constant 1 : index
    %c0_5 = arith.constant 0 : index
    %7 = vector.load %arg5[%c1_4, %c0_5] : memref<8x32xf32, #tpu.memory_space<vmem>>, vector<1x32xf32>
    tpu.vector_store %arg5[%c1_4, %c0_5], %6 {strides = array<i32>} : memref<8x32xf32, #tpu.memory_space<vmem>>, vector<1x32xf32>,
    %c2 = arith.constant 2 : index
    %8 = memref.load %arg0[%c2] : memref<8xi32, #tpu.memory_space<smem>>
    %9 = arith.index_cast %8 : i32 to index
    %c0_6 = arith.constant 0 : index
    %10 = vector.load %arg2[%9, %c0_6] : memref<64x32xf32, #tpu.memory_space<vmem>>, vector<1x32xf32>
    %c2_7 = arith.constant 2 : index
    %c0_8 = arith.constant 0 : index
    %11 = vector.load %arg5[%c2_7, %c0_8] : memref<8x32xf32, #tpu.memory_space<vmem>>, vector<1x32xf32>
    tpu.vector_store %arg5[%c2_7, %c0_8], %10 {strides = array<i32>} : memref<8x32xf32, #tpu.memory_space<vmem>>, vector<1x32xf32>,
    %c3 = arith.constant 3 : index
    %12 = memref.load %arg0[%c3] : memref<8xi32, #tpu.memory_space<smem>>
    %13 = arith.index_cast %12 : i32 to index
    %c0_9 = arith.constant 0 : index
    %14 = vector.load %arg2[%13, %c0_9] : memref<64x32xf32, #tpu.memory_space<vmem>>, vector<1x32xf32>
    %c3_10 = arith.constant 3 : index
    %c0_11 = arith.constant 0 : index
    %15 = vector.load %arg5[%c3_10, %c0_11] : memref<8x32xf32, #tpu.memory_space<vmem>>, vector<1x32xf32>
    tpu.vector_store %arg5[%c3_10, %c0_11], %14 {strides = array<i32>} : memref<8x32xf32, #tpu.memory_space<vmem>>, vector<1x32xf32>,
    %c4 = arith.constant 4 : index
    %16 = memref.load %arg0[%c4] : memref<8xi32, #tpu.memory_space<smem>>
    %17 = arith.index_cast %16 : i32 to index
    %c0_12 = arith.constant 0 : index
    %18 = vector.load %arg2[%17, %c0_12] : memref<64x32xf32, #tpu.memory_space<vmem>>, vector<1x32xf32>
    %c4_13 = arith.constant 4 : index
    %c0_14 = arith.constant 0 : index
    %19 = vector.load %arg5[%c4_13, %c0_14] : memref<8x32xf32, #tpu.memory_space<vmem>>, vector<1x32xf32>
    tpu.vector_store %arg5[%c4_13, %c0_14], %18 {strides = array<i32>} : memref<8x32xf32, #tpu.memory_space<vmem>>, vector<1x32xf32>,
    %c5 = arith.constant 5 : index
    %20 = memref.load %arg0[%c5] : memref<8xi32, #tpu.memory_space<smem>>
    %21 = arith.index_cast %20 : i32 to index
    %c0_15 = arith.constant 0 : index
    %22 = vector.load %arg2[%21, %c0_15] : memref<64x32xf32, #tpu.memory_space<vmem>>, vector<1x32xf32>
    %c5_16 = arith.constant 5 : index
    %c0_17 = arith.constant 0 : index
    %23 = vector.load %arg5[%c5_16, %c0_17] : memref<8x32xf32, #tpu.memory_space<vmem>>, vector<1x32xf32>
    tpu.vector_store %arg5[%c5_16, %c0_17], %22 {strides = array<i32>} : memref<8x32xf32, #tpu.memory_space<vmem>>, vector<1x32xf32>,
    %c6 = arith.constant 6 : index
    %24 = memref.load %arg0[%c6] : memref<8xi32, #tpu.memory_space<smem>>
    %25 = arith.index_cast %24 : i32 to index
    %c0_18 = arith.constant 0 : index
    %26 = vector.load %arg2[%25, %c0_18] : memref<64x32xf32, #tpu.memory_space<vmem>>, vector<1x32xf32>
    %c6_19 = arith.constant 6 : index
    %c0_20 = arith.constant 0 : index
    %27 = vector.load %arg5[%c6_19, %c0_20] : memref<8x32xf32, #tpu.memory_space<vmem>>, vector<1x32xf32>
    tpu.vector_store %arg5[%c6_19, %c0_20], %26 {strides = array<i32>} : memref<8x32xf32, #tpu.memory_space<vmem>>, vector<1x32xf32>,
    %c7 = arith.constant 7 : index
    %28 = memref.load %arg0[%c7] : memref<8xi32, #tpu.memory_space<smem>>
    %29 = arith.index_cast %28 : i32 to index
    %c0_21 = arith.constant 0 : index
    %30 = vector.load %arg2[%29, %c0_21] : memref<64x32xf32, #tpu.memory_space<vmem>>, vector<1x32xf32>
    %c7_22 = arith.constant 7 : index
    %c0_23 = arith.constant 0 : index
    %31 = vector.load %arg5[%c7_22, %c0_23] : memref<8x32xf32, #tpu.memory_space<vmem>>, vector<1x32xf32>
    tpu.vector_store %arg5[%c7_22, %c0_23], %30 {strides = array<i32>} : memref<8x32xf32, #tpu.memory_space<vmem>>, vector<1x32xf32>,
    %c0_24 = arith.constant 0 : index
    %c0_25 = arith.constant 0 : index
    %32 = vector.load %arg5[%c0_24, %c0_25] : memref<8x32xf32, #tpu.memory_space<vmem>>, vector<8x32xf32>
    %c0_26 = arith.constant 0 : index
    %c0_27 = arith.constant 0 : index
    %33 = vector.load %arg3[%c0_26, %c0_27] : memref<128x32xf32, #tpu.memory_space<vmem>>, vector<128x32xf32>
    %cst = arith.constant dense<0.000000e+00> : vector<8x128xf32>
    %34 = tpu.matmul %32, %33, %cst {dimension_numbers = #tpu.dot_dimension_numbers<[1], [1], [0], [0], [0, 0, 1, 0], [], []>, precision = #tpu.contract_precision<fp32>} : vector<8x32xf32>, vector<128x32xf32>, vector<8x128xf32> -> vector<8x128xf32>
    %c0_28 = arith.constant 0 : index
    %c0_29 = arith.constant 0 : index
    %c0_30 = arith.constant 0 : index
    %35 = vector.load %arg1[%c0_28, %c0_29, %c0_30] : memref<8x8x1xi32, #tpu.memory_space<vmem>>, vector<8x8x1xi32>
    %36 = tpu.iota {dimensions = array<i32: 2>} : vector<8x8x128xi32>
    %37 = vector.broadcast %35 : vector<8x8x1xi32> to vector<8x8x128xi32>
    %38 = arith.cmpi eq, %36, %37 : vector<8x8x128xi32>
    %cst_31 = arith.constant 1.000000e+00 : f32
    %cst_32 = arith.constant 0.000000e+00 : f32
    %39 = vector.broadcast %cst_31 : f32 to vector<8x8x128xf32>
    %40 = vector.broadcast %cst_32 : f32 to vector<8x8x128xf32>
    %41 = arith.select %38, %39, %40 : vector<8x8x128xi1>, vector<8x8x128xf32>
    %42 = vector.shape_cast %34 : vector<8x128xf32> to vector<8x1x128xf32>
    %43 = vector.broadcast %42 : vector<8x1x128xf32> to vector<8x8x128xf32>
    %44 = arith.mulf %41, %43 : vector<8x8x128xf32>
    %cst_33 = arith.constant dense<0.000000e+00> : vector<8x8xf32>
    %45 = vector.multi_reduction <add>, %44, %cst_33 [2] : vector<8x8x128xf32> to vector<8x8xf32>
    %cst_34 = arith.constant 0.000000e+00 : f32
    %46 = vector.broadcast %cst_34 : f32 to vector<8x8xf32>
    %47 = arith.subf %46, %45 : vector<8x8xf32>
    %cst_35 = arith.constant 0.000000e+00 : f32
    %48 = vector.broadcast %cst_35 : f32 to vector<8x8xf32>
    %49 = arith.maximumf %47, %48 : vector<8x8xf32>
    %50 = math.absf %45 : vector<8x8xf32>
    %cst_36 = arith.constant 0.000000e+00 : f32
    %51 = vector.broadcast %cst_36 : f32 to vector<8x8xf32>
    %52 = arith.subf %51, %50 : vector<8x8xf32>
    %53 = math.exp %52 : vector<8x8xf32>
    %cst_37 = arith.constant 1.000000e+00 : f32
    %54 = vector.broadcast %cst_37 : f32 to vector<8x8xf32>
    %55 = arith.addf %54, %53 : vector<8x8xf32>
    %56 = math.log %55 : vector<8x8xf32>
    %57 = arith.addf %49, %56 : vector<8x8xf32>
    %58 = arith.negf %45 : vector<8x8xf32>
    %59 = math.exp %58 : vector<8x8xf32>
    %cst_38 = arith.constant 1.000000e+00 : f32
    %60 = vector.broadcast %cst_38 : f32 to vector<8x8xf32>
    %61 = arith.addf %60, %59 : vector<8x8xf32>
    %62 = arith.divf %60, %61 : vector<8x8xf32>
    %cst_39 = arith.constant 1.000000e+00 : f32
    %63 = vector.broadcast %cst_39 : f32 to vector<8x8xf32>
    %64 = arith.subf %63, %62 : vector<8x8xf32>
    %cst_40 = arith.constant 1.000000e-03 : f32
    %65 = vector.broadcast %cst_40 : f32 to vector<8x8xf32>
    %66 = arith.addf %64, %65 : vector<8x8xf32>
    %67 = math.log %66 : vector<8x8xf32>
    %cst_41 = arith.constant 0.000000e+00 : f32
    %68 = vector.broadcast %cst_41 : f32 to vector<8x8xf32>
    %69 = arith.subf %68, %67 : vector<8x8xf32>
    %70 = tpu.iota {dimensions = array<i32: 1>} : vector<8x8xi32>
    %c4_i32 = arith.constant 4 : i32
    %71 = vector.broadcast %c4_i32 : i32 to vector<8x8xi32>
    %72 = arith.cmpi slt, %70, %71 : vector<8x8xi32>
    %cst_42 = arith.constant 3.125000e-02 : f32
    %73 = vector.broadcast %cst_42 : f32 to vector<8x8xf32>
    %74 = arith.mulf %57, %73 : vector<8x8xf32>
    %cst_43 = arith.constant 3.125000e-02 : f32
    %75 = vector.broadcast %cst_43 : f32 to vector<8x8xf32>
    %76 = arith.mulf %69, %75 : vector<8x8xf32>
    %77 = arith.select %72, %74, %76 : vector<8x8xi1>, vector<8x8xf32>
    %78 = vector.shape_cast %77 : vector<8x8xf32> to vector<1x8x8xf32>
    %cst_44 = arith.constant dense<0.000000e+00> : vector<1xf32>
    %79 = vector.multi_reduction <add>, %78, %cst_44 [1, 2] : vector<1x8x8xf32> to vector<1xf32>
    %80 = vector.shape_cast %79 : vector<1xf32> to vector<1x1x1xf32>
    %81 = vector.extract %80[0, 0, 0] : f32 from vector<1x1x1xf32>
    %c0_45 = arith.constant 0 : index
    %c0_46 = arith.constant 0 : index
    %82 = memref.load %arg4[%c0_45, %c0_46] : memref<1x1xf32, #tpu.memory_space<smem>>
    memref.store %81, %arg4[%c0_45, %c0_46] : memref<1x1xf32, #tpu.memory_space<smem>>
    return
  }
}

</mosaic_0001>

<bundles_post_ra>
// kernel: tpu_custom_call.1
= control target key start
LH: loop header
LB: loop body
LE: loop exit
PB: predicated region body
PF: predicated region fallthrough
CT: control target
= control target key end

     0   :  { %9 = vsyncpa [#allocation5], 0  ;;  %s2376_s0 = inlined_call_operand.vmem [shape: s32[8], index: 0, kind: input, shape index: {}]   ;;  %s2377_s1 = inlined_call_operand.vmem [shape: s32[8,8,1], index: 1, kind: input, shape index: {}]   ;;  %s2378_s2 = inlined_call_operand.vmem [shape: f32[64,32], index: 2, kind: input, shape index: {}]   ;;  %s2379_s3 = inlined_call_operand.vmem [shape: f32[128,32], index: 3, kind: input, shape index: {}]   ;;  %s2380_s4 = inlined_call_operand.hbm [shape: f32[1,1], index: 4, kind: output, shape index: {}]  }
   0x1   :  { %10 = vsyncpa [#allocation4], 0  ;;  %s17_s17 = sshll.u32 %s2376_s0, 4  ;;  %s18_s17 = int_to_ptr.vmem [resolvable:$true] %s17_s17 }
   0x2   :  { %s1833_s18 = scalar_lea.vmem %s18_s17, 16  ;;  %p1838_p1 = scmp.lt.s32.totalorder %s18_s17, %s18_s17 }
   0x3   :  { %p1834_p0 = scmp.ne.s32.totalorder %s18_s17, %s1833_s18  ;;  %p1839_p2 = scmp.lt.s32.totalorder %s1833_s18, %s1833_s18 }
   0x5   :  { %p1840_p3 = por %p1839_p2, %p1838_p1 }
   0x7   :  { %p1841_p4 = pnand %p1840_p3, %p1834_p0 }
   0x9   :  { %1844 = shalt.err (!%p1841_p4)
}
   0xa   :  { %s1859_s19 = smov [#allocation3]  }
   0xb   :  { %20 = dma.vmem_to_smem %s18_s17, 16, %s1859_s19, [#allocation5]  }
   0xc   :  { %1855 = dma.done.wait [#allocation5], 16  }
   0xd   :  { %1856 = vsyncadd [#allocation5], 4294967280 }
   0xe   :  { %30 = sfence }
   0xf   :  { %v65_v0 = vld [vmem:[%s2379_s3] sm:$0xff]  ;;  %v66_v1 = vld [vmem:[%s2379_s3 + $0x8] sm:$0xff]  ;;  %vm81_vm0 = vcmask 261120   ;;  %v67_v2 = vld [vmem:[%s2379_s3 + $0x10] sm:$0xff]  ;;  %v1860_v3 = vmov 0.0|0.0   ;;  %s31_s27 = sld [smem:[#allocation3]] }
  0x10   :  { %1589 = vmatprep.subr.bf16.mxu1 %v1860_v3  ;;  %1661 = vmatprep.subr.bf16.mxu0 %v1860_v3  ;;  %v1906_v4 = vsel %vm81_vm0, %v65_v0, 0  ;;  %v1909_v5 = vsel %vm81_vm0, %v66_v1, 0  ;;  %v68_v6 = vld [vmem:[%s2379_s3 + $0x18] sm:$0xff]  ;;  %v1917_v9 = vsel %vm81_vm0, %v67_v2, 0  ;;  %s1262_s28 = sld [smem:[#allocation3 + $0x1]]  ;;  %s1263_s29 = sld [smem:[#allocation3 + $0x2]] }
  0x11   :  { %v134_v7 = vand.u32 4294901760, %v1906_v4  ;;  %v137_v8 = vand.u32 4294901760, %v1909_v5  ;;  %v1920_v10 = vsel %vm81_vm0, %v68_v6, 0  ;;  %v140_v12 = vand.u32 4294901760, %v1917_v9  ;;  %s1264_s30 = sld [smem:[#allocation3 + $0x3]]  ;;  %v69_v14 = vld [vmem:[%s2379_s3 + $0x20] sm:$0xff] }
  0x12   :  { %v143_v13 = vand.u32 4294901760, %v1920_v10  ;;  %v70_v15 = vld [vmem:[%s2379_s3 + $0x28] sm:$0xff]  ;;  %s1265_s9 = sld [smem:[#allocation3 + $0x4]]  ;;  %s1940_s10 = sld [smem:[#allocation3 + $0x5]]  ;;  %v98_v17 = vsel %vm81_vm0, %v69_v14, 0  ;;  %vm34_vm1 = vcmask 253952  }
  0x13   :  { %v1926_v11 = vpack.c.bf16 %v137_v8, %v134_v7  ;;  %s1942_s11 = sld [smem:[#allocation3 + $0x6]]  ;;  %s1953_s15 = sld [smem:[#allocation3 + $0x7]]  ;;  %v101_v18 = vsel %vm81_vm0, %v70_v15, 0  ;;  %v146_v21 = vand.u32 4294901760, %v98_v17  ;;  %v71_v25 = vld [vmem:[%s2379_s3 + $0x30] sm:$0xff]  ;;  %v72_v27 = vld [vmem:[%s2379_s3 + $0x38] sm:$0xff]  ;;  %v2024_v42 = vsub.f32 %v1906_v4, %v134_v7 }
  0x14   :  { %v1948_v16 = vpack.c.bf16 %v143_v13, %v140_v12  ;;  %v149_v22 = vand.u32 4294901760, %v101_v18  ;;  %vm1861_vm2 = vmmov 0   ;;  %v1862_v28 = vmov 0.0   ;;  %v73_v37 = vld [vmem:[%s2379_s3 + $0x40] sm:$0xff]  ;;  %v74_v38 = vld [vmem:[%s2379_s3 + $0x48] sm:$0xff]  ;;  %v75_v51 = vld [vmem:[%s2379_s3 + $0x50] sm:$0xff] }
  0x15   :  { %1591 = vmatpush3.bf16.xpose.msra.mxu1 %v1926_v11  ;;  %1663 = vmatpush3.bf16.xpose.msra.mxu0 %v1926_v11  ;;  %s32_s14 = scalar_lea.vmem %s2378_s2, %s31_s27  ;;  %v104_v33 = vsel %vm81_vm0, %v71_v25, 0  ;;  %v107_v34 = vsel %vm81_vm0, %v72_v27, 0  ;;  %v110_v40 = vsel %vm81_vm0, %v73_v37, 0  ;;  %v113_v41 = vsel %vm81_vm0, %v74_v38, 0  ;;  %v76_v52 = vld [vmem:[%s2379_s3 + $0x58] sm:$0xff]  ;;  %v78_v6 = vld [vmem:[%s2379_s3 + $0x68] sm:$0xff] }
  0x16   :  { %1592 = vmatprep.subr.bf16.mxu1 %v1860_v3  ;;  %1664 = vmatprep.subr.bf16.mxu0 %v1860_v3  ;;  %v33_v19 = vld [vmem:[%s32_s14] sm:$0x1]  ;;  %s37_s18 = scalar_lea.vmem %s2378_s2, %s1262_s28  ;;  %s41_s21 = scalar_lea.vmem %s2378_s2, %s1263_s29  ;;  %v2002_v32 = vpack.c.bf16 %v149_v22, %v146_v21  ;;  %v152_v35 = vand.u32 4294901760, %v104_v33  ;;  %v155_v36 = vand.u32 4294901760, %v107_v34  ;;  %v2029_v43 = vsub.f32 %v1909_v5, %v137_v8 }
  0x17   :  { %v38_v20 = vld [vmem:[%s37_s18] sm:$0x1]  ;;  %s45_s0 = scalar_lea.vmem %s2378_s2, %s1264_s30  ;;  %35 = vst.msk [vmem:[#allocation2] sm:$0x1] %vm34_vm1, %v33_v19  ;;  %1411 = vmatprep.mubr.msk.f32.mxu1 %vm1861_vm2, %v1862_v28  ;;  %1516 = vmatprep.mubr.msk.f32.mxu0 %vm1861_vm2, %v1862_v28  ;;  %v2034_v44 = vsub.f32 %v1917_v9, %v140_v12  ;;  %v2039_v45 = vsub.f32 %v1920_v10, %v143_v13  ;;  %v158_v49 = vand.u32 4294901760, %v110_v40  ;;  %v161_v50 = vand.u32 4294901760, %v113_v41 }
  0x18   :  { %39 = vst.msk [vmem:[#allocation2 + $0x1] sm:$0x1] %vm34_vm1, %v38_v20  ;;  %v42_v23 = vld [vmem:[%s41_s21] sm:$0x1]  ;;  %s49_s26 = scalar_lea.vmem %s2378_s2, %s1265_s9  ;;  %s53_s5 = scalar_lea.vmem %s2378_s2, %s1940_s10  ;;  %v2017_v39 = vpack.c.bf16 %v155_v36, %v152_v35  ;;  %v2041_v46 = vsub.f32 %v98_v17, %v146_v21  ;;  %v2043_v47 = vsub.f32 %v101_v18, %v149_v22  ;;  %v2045_v48 = vsub.f32 %v104_v33, %v152_v35  ;;  %v79_v18 = vld [vmem:[%s2379_s3 + $0x70] sm:$0xff]  ;;  %v80_v19 = vld [vmem:[%s2379_s3 + $0x78] sm:$0xff] }
  0x19   :  { %v46_v24 = vld [vmem:[%s45_s0] sm:$0x1]  ;;  %43 = vst.msk [vmem:[#allocation2 + $0x2] sm:$0x1] %vm34_vm1, %v42_v23  ;;  %s57_s8 = scalar_lea.vmem %s2378_s2, %s1942_s11  ;;  %s61_s11 = scalar_lea.vmem %s2378_s2, %s1953_s15  ;;  %v2054_v53 = vsub.f32 %v107_v34, %v155_v36  ;;  %v1638_v54 = vpack.c.bf16 %v2029_v43, %v2024_v42  ;;  %v1641_v55 = vpack.c.bf16 %v2039_v45, %v2034_v44  ;;  %v2063_v56 = vsub.f32 %v110_v40, %v158_v49 }
  0x1a   :  { %47 = vst.msk [vmem:[#allocation2 + $0x3] sm:$0x1] %vm34_vm1, %v46_v24  ;;  %v50_v26 = vld [vmem:[%s49_s26] sm:$0x1]  ;;  %v2065_v57 = vsub.f32 %v113_v41, %v161_v50  ;;  %v116_v58 = vsel %vm81_vm0, %v75_v51, 0  ;;  %v119_v59 = vsel %vm81_vm0, %v76_v52, 0  ;;  %v1644_v60 = vpack.c.bf16 %v2043_v47, %v2041_v46 }
  0x1b   :  { %51 = vst.msk [vmem:[#allocation2 + $0x4] sm:$0x1] %vm34_vm1, %v50_v26  ;;  %v54_v29 = vld [vmem:[%s53_s5] sm:$0x1]  ;;  %v1647_v61 = vpack.c.bf16 %v2054_v53, %v2045_v48  ;;  %v2075_v63 = vpack.c.bf16 %v161_v50, %v158_v49  ;;  %v164_v0 = vand.u32 4294901760, %v116_v58  ;;  %v167_v1 = vand.u32 4294901760, %v119_v59 }
  0x1c   :  { %v58_v30 = vld [vmem:[%s57_s8] sm:$0x1]  ;;  %55 = vst.msk [vmem:[#allocation2 + $0x5] sm:$0x1] %vm34_vm1, %v54_v29  ;;  %v1650_v62 = vpack.c.bf16 %v2065_v57, %v2063_v56  ;;  %v125_v9 = vsel %vm81_vm0, %v78_v6, 0  ;;  %v128_v22 = vsel %vm81_vm0, %v79_v18, 0 }
  0x1d   :  { %1594 = vmatpush3.bf16.xpose.msra.mxu1 %v1948_v16  ;;  %1666 = vmatpush3.bf16.xpose.msra.mxu0 %v1948_v16  ;;  %59 = vst.msk [vmem:[#allocation2 + $0x6] sm:$0x1] %vm34_vm1, %v58_v30  ;;  %v62_v31 = vld [vmem:[%s61_s11] sm:$0x1]  ;;  %v2077_v2 = vsub.f32 %v116_v58, %v164_v0  ;;  %v2079_v4 = vsub.f32 %v119_v59, %v167_v1  ;;  %v173_v13 = vand.u32 4294901760, %v125_v9  ;;  %v131_v23 = vsel %vm81_vm0, %v80_v19, 0 }
  0x1e   :  { %1595 = vmatprep.subr.bf16.mxu1 %v1860_v3  ;;  %1667 = vmatprep.subr.bf16.mxu0 %v1860_v3  ;;  %63 = vst.msk [vmem:[#allocation2 + $0x7] sm:$0x1] %vm34_vm1, %v62_v31  ;;  %v77_v5 = vld [vmem:[%s2379_s3 + $0x60] sm:$0xff]  ;;  %v2095_v10 = vpack.c.bf16 %v167_v1, %v164_v0  ;;  %v176_v26 = vand.u32 4294901760, %v128_v22  ;;  %v179_v27 = vand.u32 4294901760, %v131_v23  ;;  %v227_v33 = vand.u32 4294901760, %v2024_v42 }
  0x1f   :  { %v1653_v7 = vpack.c.bf16 %v2079_v4, %v2077_v2  ;;  %v122_v8 = vsel %vm81_vm0, %v77_v5, 0  ;;  %v2099_v17 = vsub.f32 %v125_v9, %v173_v13  ;;  %v234_v34 = vand.u32 4294901760, %v2029_v43  ;;  %s1845_s18 = scalar_lea.hbm %s2380_s4, 16 }
  0x20   :  { %v170_v12 = vand.u32 4294901760, %v122_v8  ;;  %v2120_v29 = vsub.f32 %v128_v22, %v176_v26  ;;  %v2122_v30 = vsub.f32 %v131_v23, %v179_v27  ;;  %v2136_v37 = vpack.c.bf16 %v179_v27, %v176_v26  ;;  %v775_v26 = vld [vmem:[%s2377_s1 + $0x8] sm:$0xff]  ;;  %v777_v27 = vld [vmem:[%s2377_s1 + $0x18] sm:$0xff]  ;;  %p1846_p5 = scmp.ne.s32.totalorder %s2380_s4, %s1845_s18  ;;  %p1849_p6 = scmp.lt.u32.totalorder %s1845_s18, %s2380_s4 }
  0x21   :  { %v228_v38 = vsub.f32 %v2024_v42, %v227_v33  ;;  %v235_v40 = vsub.f32 %v2029_v43, %v234_v34  ;;  %v241_v51 = vand.u32 4294901760, %v2034_v44  ;;  %v248_v52 = vand.u32 4294901760, %v2039_v45 }
  0x22   :  { %v2097_v15 = vsub.f32 %v122_v8, %v170_v12  ;;  %v2118_v25 = vpack.c.bf16 %v173_v13, %v170_v12  ;;  %v1659_v35 = vpack.c.bf16 %v2122_v30, %v2120_v29  ;;  %v1686_v0 = vpack.c.bf16 %v234_v34, %v227_v33  ;;  %v774_v13 = vld [vmem:[%s2377_s1] sm:$0xff]  ;;  %p1851_p7 = pnand %p1849_p6, %p1846_p5 }
  0x23   :  { %v229_v49 = vand.u32 4294901760, %v228_v38  ;;  %v236_v50 = vand.u32 4294901760, %v235_v40  ;;  %v242_v1 = vsub.f32 %v2034_v44, %v241_v51  ;;  %v249_v5 = vsub.f32 %v2039_v45, %v248_v52  ;;  %v778_v40 = vld [vmem:[%s2377_s1 + $0x20] sm:$0xff] }
  0x24   :  { %v1656_v21 = vpack.c.bf16 %v2099_v17, %v2097_v15  ;;  %v255_v6 = vand.u32 4294901760, %v2041_v46  ;;  %v262_v12 = vand.u32 4294901760, %v2043_v47  ;;  %v1689_v18 = vpack.c.bf16 %v248_v52, %v241_v51 }
  0x25   :  { %1597 = vmatpush3.bf16.xpose.msra.mxu1 %v2002_v32  ;;  %1669 = vmatpush3.bf16.xpose.msra.mxu0 %v2002_v32  ;;  %v64_v14 = vld [vmem:[#allocation2] sm:$0xff]  ;;  %v1614_v59 = vpack.c.bf16 %v236_v50, %v229_v49  ;;  %v243_v8 = vand.u32 4294901760, %v242_v1  ;;  %v250_v9 = vand.u32 4294901760, %v249_v5  ;;  %v1863_v19 = vmov 0  }
  0x26   :  { %1598 = vmatprep.subr.bf16.mxu1 %v1860_v3  ;;  %1670 = vmatprep.subr.bf16.mxu0 %v1860_v3  ;;  %v83_v20 = vsel %vm81_vm0, %v64_v14, 0  ;;  %v776_v14 = vld [vmem:[%s2377_s1 + $0x10] sm:$0xff]  ;;  %v256_v22 = vsub.f32 %v2041_v46, %v255_v6  ;;  %v263_v23 = vsub.f32 %v2043_v47, %v262_v12  ;;  %v276_v38 = vand.u32 4294901760, %v2054_v53 }
  0x27   :  { %v2116_v24 = vand.u32 4294901760, %v83_v20  ;;  %1751 = vset.pattern.permute.xlu0 %v1863_v19  ;;  %1752 = vset.pattern.permute.xlu1 %v1863_v19  ;;  %v1692_v50 = vpack.c.bf16 %v262_v12, %v255_v6  ;;  %v283_v5 = vand.u32 4294901760, %v2063_v56  ;;  %v290_v6 = vand.u32 4294901760, %v2065_v57 }
  0x28   :  { %785 = vperm.xlu0 %1751, %v774_v13   ;;  %791 = vperm.xlu1 %1752, %v776_v14   ;;  %v257_v33 = vand.u32 4294901760, %v256_v22  ;;  %v264_v34 = vand.u32 4294901760, %v263_v23  ;;  %v277_v52 = vsub.f32 %v2054_v53, %v276_v38  ;;  %v297_v19 = vand.u32 4294901760, %v2077_v2 }
  0x29   :  { %v2125_v31 = vsub.f32 %v83_v20, %v2116_v24  ;;  %v1617_v20 = vpack.c.bf16 %v250_v9, %v243_v8  ;;  %v284_v12 = vsub.f32 %v2063_v56, %v283_v5  ;;  %v291_v13 = vsub.f32 %v2065_v57, %v290_v6 }
  0x2a   :  { %v1620_v49 = vpack.c.bf16 %v264_v34, %v257_v33  ;;  %v278_v1 = vand.u32 4294901760, %v277_v52  ;;  %v1698_v23 = vpack.c.bf16 %v290_v6, %v283_v5  ;;  %vm1163_vm11 = vcmask 1041409  }
  0x2b   :  { %v216_v36 = vand.u32 4294901760, %v2125_v31  ;;  %v285_v14 = vand.u32 4294901760, %v284_v12  ;;  %vm1165_vm12 = vcmask 1042434   ;;  %vm1167_vm13 = vcmask 1043459  }
  0x2c   :  { %788 = vperm.xlu0 %1751, %v775_v26   ;;  %794 = vperm.xlu1 %1752, %v777_v27   ;;  %v298_v26 = vsub.f32 %v2077_v2, %v297_v19  ;;  %vm1169_vm14 = vcmask 1044484   ;;  %vm1171_vm15 = vcmask 1045509   ;;  %vm1173_vm0 = vcmask 1046534  }
  0x2d   :  { %1600 = vmatpush3.bf16.xpose.msra.mxu1 %v2017_v39  ;;  %1672 = vmatpush3.bf16.xpose.msra.mxu0 %v2017_v39  ;;  %v217_v41 = vsub.f32 %v2125_v31, %v216_v36  ;;  %vm1175_vm1 = vcmask 1047559  }
  0x2e   :  { %1601 = vmatprep.subr.bf16.mxu1 %v1860_v3  ;;  %1673 = vmatprep.subr.bf16.mxu0 %v1860_v3  ;;  %v299_v33 = vand.u32 4294901760, %v298_v26 }
  0x2f   :  { %v218_v58 = vand.u32 4294901760, %v217_v41  ;;  %v779_v41 = vld [vmem:[%s2377_s1 + $0x28] sm:$0xff] }
  0x30   :  { %797 = vperm.xlu0 %1751, %v778_v40   ;;  %800 = vperm.xlu1 %1752, %v779_v41  }
  0x35   :  { %1603 = vmatpush3.bf16.xpose.msra.mxu1 %v2075_v63  ;;  %1675 = vmatpush3.bf16.xpose.msra.mxu0 %v2075_v63 }
  0x36   :  { %1604 = vmatprep.subr.bf16.mxu1 %v1860_v3  ;;  %1676 = vmatprep.subr.bf16.mxu0 %v1860_v3 }
  0x3d   :  { %1606 = vmatpush3.bf16.xpose.msra.mxu1 %v2095_v10  ;;  %1678 = vmatpush3.bf16.xpose.msra.mxu0 %v2095_v10 }
  0x3e   :  { %1607 = vmatprep.subr.bf16.mxu1 %v1860_v3  ;;  %1679 = vmatprep.subr.bf16.mxu0 %v1860_v3 }
  0x45   :  { %1609 = vmatpush3.bf16.xpose.msra.mxu1 %v2118_v25  ;;  %1681 = vmatpush3.bf16.xpose.msra.mxu0 %v2118_v25 }
  0x46   :  { %1610 = vmatprep.subr.bf16.mxu1 %v1860_v3  ;;  %1682 = vmatprep.subr.bf16.mxu0 %v1860_v3 }
  0x4d   :  { %1612 = vmatpush3.bf16.xpose.msra.mxu1 %v2136_v37  ;;  %1684 = vmatpush3.bf16.xpose.msra.mxu0 %v2136_v37 }
  0x4e   :  { %1613 = vmatprep.subr.bf16.mxu1 %v1860_v3  ;;  %1685 = vmatprep.subr.bf16.mxu0 %v1860_v3 }
  0x54   :  { %1412 = vmatmul.mubr.f32.vlgmr.msra.gmra.mrb[0].mxu1 %v218_v58  ;;  %1517 = vmatmul.mubr.f32.vlgmr.msra.gmra.mrb[0].mxu0 %v216_v36  ;;  %v269_v36 = vand.u32 4294901760, %v2045_v48  ;;  %v780_v58 = vld [vmem:[%s2377_s1 + $0x30] sm:$0xff] }
  0x55   :  { %1615 = vmatpush3.bf16.xpose.msra.mxu1 %v1614_v59  ;;  %1687 = vmatpush3.bf16.xpose.msra.mxu0 %v1686_v0  ;;  %v781_v59 = vld [vmem:[%s2377_s1 + $0x38] sm:$0xff] }
  0x56   :  { %1616 = vmatprep.subr.bf16.mxu1 %v1860_v3  ;;  %1688 = vmatprep.subr.bf16.mxu0 %v1860_v3  ;;  %v270_v51 = vsub.f32 %v2045_v48, %v269_v36  ;;  %v1695_v9 = vpack.c.bf16 %v276_v38, %v269_v36  ;;  %v311_v36 = vand.u32 4294901760, %v2097_v15  ;;  %v318_v38 = vand.u32 4294901760, %v2099_v17 }
  0x57   :  { %1446 = vmatprep.mubr.msk.f32.mxu1 %vm1861_vm2, %v1862_v28  ;;  %1551 = vmatprep.mubr.msk.f32.mxu0 %vm1861_vm2, %v1862_v28 }
  0x58   :  { %v271_v0 = vand.u32 4294901760, %v270_v51  ;;  %803 = vperm.xlu0 %1751, %v780_v58   ;;  %806 = vperm.xlu1 %1752, %v781_v59   ;;  %v325_v58 = vand.u32 4294901760, %v2120_v29  ;;  %v332_v59 = vand.u32 4294901760, %v2122_v30 }
  0x5a   :  { %v1623_v8 = vpack.c.bf16 %v278_v1, %v271_v0  ;;  %v1704_v1 = vpack.c.bf16 %v318_v38, %v311_v36  ;;  %v326_v5 = vsub.f32 %v2120_v29, %v325_v58  ;;  %v333_v6 = vsub.f32 %v2122_v30, %v332_v59 }
  0x5d   :  { %1618 = vmatpush3.bf16.xpose.msra.mxu1 %v1617_v20  ;;  %1690 = vmatpush3.bf16.xpose.msra.mxu0 %v1689_v18  ;;  %v292_v18 = vand.u32 4294901760, %v291_v13  ;;  %v304_v20 = vand.u32 4294901760, %v2079_v4  ;;  %v1707_v13 = vpack.c.bf16 %v332_v59, %v325_v58 }
  0x5e   :  { %1619 = vmatprep.subr.bf16.mxu1 %v1860_v3  ;;  %1691 = vmatprep.subr.bf16.mxu0 %v1860_v3 }
  0x5f   :  { %v1626_v22 = vpack.c.bf16 %v292_v18, %v285_v14  ;;  %v305_v27 = vsub.f32 %v2079_v4, %v304_v20  ;;  %v1701_v41 = vpack.c.bf16 %v304_v20, %v297_v19 }
  0x61   :  { %v306_v34 = vand.u32 4294901760, %v305_v27 }
  0x63   :  { %v1629_v40 = vpack.c.bf16 %v306_v34, %v299_v33 }
  0x65   :  { %1621 = vmatpush3.bf16.xpose.msra.mxu1 %v1620_v49  ;;  %1693 = vmatpush3.bf16.xpose.msra.mxu0 %v1692_v50  ;;  %v312_v49 = vsub.f32 %v2097_v15, %v311_v36  ;;  %v319_v50 = vsub.f32 %v2099_v17, %v318_v38 }
  0x66   :  { %1622 = vmatprep.subr.bf16.mxu1 %v1860_v3  ;;  %1694 = vmatprep.subr.bf16.mxu0 %v1860_v3 }
  0x67   :  { %v313_v51 = vand.u32 4294901760, %v312_v49  ;;  %v320_v52 = vand.u32 4294901760, %v319_v50 }
  0x69   :  { %v1632_v0 = vpack.c.bf16 %v320_v52, %v313_v51 }
  0x6d   :  { %1624 = vmatpush3.bf16.xpose.msra.mxu1 %v1623_v8  ;;  %1696 = vmatpush3.bf16.xpose.msra.mxu0 %v1695_v9  ;;  %v327_v8 = vand.u32 4294901760, %v326_v5  ;;  %v334_v9 = vand.u32 4294901760, %v333_v6 }
  0x6e   :  { %1625 = vmatprep.subr.bf16.mxu1 %v1860_v3  ;;  %1697 = vmatprep.subr.bf16.mxu0 %v1860_v3 }
  0x6f   :  { %v1635_v12 = vpack.c.bf16 %v334_v9, %v327_v8 }
  0x75   :  { %1627 = vmatpush3.bf16.xpose.msra.mxu1 %v1626_v22  ;;  %1699 = vmatpush3.bf16.xpose.msra.mxu0 %v1698_v23 }
  0x76   :  { %1628 = vmatprep.subr.bf16.mxu1 %v1860_v3  ;;  %1700 = vmatprep.subr.bf16.mxu0 %v1860_v3 }
  0x7d   :  { %1630 = vmatpush3.bf16.xpose.msra.mxu1 %v1629_v40  ;;  %1702 = vmatpush3.bf16.xpose.msra.mxu0 %v1701_v41 }
  0x7e   :  { %1631 = vmatprep.subr.bf16.mxu1 %v1860_v3  ;;  %1703 = vmatprep.subr.bf16.mxu0 %v1860_v3 }
  0x85   :  { %1633 = vmatpush3.bf16.xpose.msra.mxu1 %v1632_v0  ;;  %1705 = vmatpush3.bf16.xpose.msra.mxu0 %v1704_v1 }
  0x86   :  { %1634 = vmatprep.subr.bf16.mxu1 %v1860_v3  ;;  %1706 = vmatprep.subr.bf16.mxu0 %v1860_v3 }
  0x8d   :  { %1636 = vmatpush3.bf16.xpose.msra.mxu1 %v1635_v12  ;;  %1708 = vmatpush3.bf16.xpose.msra.mxu0 %v1707_v13 }
  0x8e   :  { %1637 = vmatprep.subr.bf16.mxu1 %v1860_v3  ;;  %1709 = vmatprep.subr.bf16.mxu0 %v1860_v3 }
  0x94   :  { %1447 = vmatmul.mubr.f32.vlgmr.msra.gmra.mrb[0].mxu1 %v2116_v24  ;;  %1552 = vmatmul.mubr.f32.vlgmr.msra.gmra.mrb[0].mxu0 %v2116_v24 }
  0x95   :  { %1639 = vmatpush3.bf16.xpose.msra.mxu1 %v1638_v54  ;;  %1711 = vmatpush3.bf16.xpose.msra.mxu0 %v1926_v11  ;;  %v782_v11 = vlaneseq }
  0x96   :  { %1640 = vmatprep.subr.bf16.mxu1 %v1860_v3  ;;  %1712 = vmatprep.subr.bf16.mxu0 %v1860_v3 }
  0x97   :  { %1481 = vmatprep.mubr.msk.f32.mxu1 %vm1861_vm2, %v1862_v28  ;;  %1586 = vmatprep.mubr.msk.f32.mxu0 %vm1861_vm2, %v1862_v28  ;;  %v2271_v43 = vshrl.u32 %v782_v11, 7  ;;  %v2273_v44 = vand.u32 127, %v782_v11 }
  0x99   :  { %vm1106_vm2 = vcmp.lt.s32.totalorder %v2273_v44, 4 }
  0x9d   :  { %1642 = vmatpush3.bf16.xpose.msra.mxu1 %v1641_v55  ;;  %1714 = vmatpush3.bf16.xpose.msra.mxu0 %v1948_v16  ;;  %v1864_v16 = vmov 1966171168  }
  0x9e   :  { %1643 = vmatprep.subr.bf16.mxu1 %v1860_v3  ;;  %1715 = vmatprep.subr.bf16.mxu0 %v1860_v3 }
  0xa5   :  { %1645 = vmatpush3.bf16.xpose.msra.mxu1 %v1644_v60  ;;  %1717 = vmatpush3.bf16.xpose.msra.mxu0 %v2002_v32  ;;  %v827_v32 = vunpack.c.l.s4 %v1864_v16  ;;  %v876_v60 = vsub.s32 0, %v2271_v43 }
  0xa6   :  { %1646 = vmatprep.subr.bf16.mxu1 %v1860_v3  ;;  %1718 = vmatprep.subr.bf16.mxu0 %v1860_v3 }
  0xa7   :  { %v828_v42 = vunpack.c.0.s8 %v827_v32 }
  0xa9   :  { %v831_v46 = vsub.s32 %v828_v42, %v2271_v43 }
  0xad   :  { %1648 = vmatpush3.bf16.xpose.msra.mxu1 %v1647_v61  ;;  %1720 = vmatpush3.bf16.xpose.msra.mxu0 %v2017_v39  ;;  %v786_v39 = vpop.permute.xlu0 %785 }
  0xae   :  { %1649 = vmatprep.subr.bf16.mxu1 %v1860_v3  ;;  %1721 = vmatprep.subr.bf16.mxu0 %v1860_v3  ;;  %vm808_vm3 = vcmp.eq.s32.totalorder %v2273_v44, %v786_v39 }
  0xaf   :  { %v816_v2 = vsel %vm808_vm3, 1.0, %v1862_v28  ;;  %vm1227_vm3 = vcmask 64512  }
  0xb1   :  { %v789_v45 = vpop.permute.xlu0 %788 }
  0xb2   :  { %vm809_vm5 = vcmp.eq.s32.totalorder %v2273_v44, %v789_v45 }
  0xb5   :  { %1651 = vmatpush3.bf16.xpose.msra.mxu1 %v1650_v62  ;;  %1723 = vmatpush3.bf16.xpose.msra.mxu0 %v2075_v63 }
  0xb6   :  { %1652 = vmatprep.subr.bf16.mxu1 %v1860_v3  ;;  %1724 = vmatprep.subr.bf16.mxu0 %v1860_v3 }
  0xbd   :  { %1654 = vmatpush3.bf16.xpose.msra.mxu1 %v1653_v7  ;;  %1726 = vmatpush3.bf16.xpose.msra.mxu0 %v2095_v10  ;;  %v798_v7 = vpop.permute.xlu0 %797 }
  0xbe   :  { %1655 = vmatprep.subr.bf16.mxu1 %v1860_v3  ;;  %1727 = vmatprep.subr.bf16.mxu0 %v1860_v3  ;;  %vm812_vm7 = vcmp.eq.s32.totalorder %v2273_v44, %v798_v7 }
  0xbf   :  { %v820_v34 = vsel %vm812_vm7, 1.0, %v1862_v28 }
  0xc5   :  { %1657 = vmatpush3.bf16.xpose.msra.mxu1 %v1656_v21  ;;  %1729 = vmatpush3.bf16.xpose.msra.mxu0 %v2118_v25 }
  0xc6   :  { %1658 = vmatprep.subr.bf16.mxu1 %v1860_v3  ;;  %1730 = vmatprep.subr.bf16.mxu0 %v1860_v3  ;;  %v792_v3 = vpop.permute.xlu1 %791 }
  0xc7   :  { %vm810_vm4 = vcmp.eq.s32.totalorder %v2273_v44, %v792_v3 }
  0xca   :  { %v795_v4 = vpop.permute.xlu1 %794 }
  0xcb   :  { %vm811_vm6 = vcmp.eq.s32.totalorder %v2273_v44, %v795_v4 }
  0xcc   :  { %v819_v33 = vsel %vm811_vm6, 1.0, %v1862_v28 }
  0xcd   :  { %1660 = vmatpush3.bf16.xpose.msra.mxu1 %v1659_v35  ;;  %1732 = vmatpush3.bf16.xpose.msra.mxu0 %v2136_v37  ;;  %v818_v35 = vsel %vm810_vm4, 1.0, %v1862_v28  ;;  %v817_v37 = vsel %vm809_vm5, 1.0, %v1862_v28 }
  0xce   :  { %v801_v20 = vpop.permute.xlu1 %800 }
  0xcf   :  { %vm813_vm8 = vcmp.eq.s32.totalorder %v2273_v44, %v801_v20 }
  0xd0   :  { %v821_v50 = vsel %vm813_vm8, 1.0, %v1862_v28 }
  0xd4   :  { %1482 = vmatmul.mubr.f32.vlgmr.msra.gmra.mrb[0].mxu1 %v2125_v31  ;;  %1587 = vmatmul.mubr.f32.vlgmr.msra.gmra.mrb[0].mxu0 %v2116_v24 }
  0xd7   :  { %v804_v22 = vpop.permute.xlu0 %803  ;;  %v807_v52 = vpop.permute.xlu1 %806 }
  0xd8   :  { %vm814_vm9 = vcmp.eq.s32.totalorder %v2273_v44, %v804_v22  ;;  %vm815_vm10 = vcmp.eq.s32.totalorder %v2273_v44, %v807_v52 }
  0xd9   :  { %v822_v51 = vsel %vm814_vm9, 1.0, %v1862_v28  ;;  %v823_v1 = vsel %vm815_vm10, 1.0, %v1862_v28 }
 0x1a7   :  { %v475_v47 = vpop.f32.mrb[0].mxu1  ;;  %v770_v48 = vpop.f32.mrb[0].mxu0 }
 0x1a8   :  { %v1733_v53 = vadd.f32 %v770_v48, %v475_v47  ;;  %v1483_v54 = vpop.f32.mrb[1].mxu1  ;;  %v1588_v55 = vpop.f32.mrb[1].mxu0 }
 0x1aa   :  { %v825_v56 = vcombine.high %v1733_v53, %v1733_v53  ;;  %v832_v57 = vrot.slane %v1733_v53, %v831_v46 }
 0x1ac   :  { %v839_v61 = vrot.slane %v825_v56, %v831_v46  ;;  %v840_v62 = vcombine.high %v832_v57, %v832_v57  ;;  %v848_v63 = vrot.slane %v832_v57, %v831_v46 }
 0x1ae   :  { %v877_v10 = vrot.slane %v848_v63, %v876_v60  ;;  %v862_v15 = vrot.slane %v840_v62, %v831_v46  ;;  %v870_v17 = vcombine.high %v848_v63, %v848_v63  ;;  %v841_v21 = vcombine.high %v839_v61, %v839_v61 }
 0x1af   :  { %v855_v24 = vrot.slane %v839_v61, %v831_v46 }
 0x1b0   :  { %v914_v25 = vmul.f32 %v877_v10, %v816_v2  ;;  %v881_v29 = vrot.slane %v862_v15, %v876_v60  ;;  %v885_v30 = vrot.slane %v870_v17, %v876_v60  ;;  %v872_v31 = vcombine.high %v862_v15, %v862_v15 }
 0x1b1   :  { %v893_v18 = vrot.slane %v855_v24, %v876_v60  ;;  %v871_v19 = vcombine.high %v855_v24, %v855_v24  ;;  %v869_v27 = vrot.slane %v841_v21, %v831_v46 }
 0x1b2   :  { %922 = vadd.xlane.f32.xlu0 %v914_v25  ;;  %v915_v14 = vmul.f32 %v881_v29, %v817_v37  ;;  %v916_v23 = vmul.f32 %v885_v30, %v818_v35  ;;  %v889_v26 = vrot.slane %v872_v31, %v876_v60 }
 0x1b3   :  { %v918_v36 = vmul.f32 %v893_v18, %v820_v34  ;;  %v901_v38 = vrot.slane %v871_v19, %v876_v60  ;;  %v897_v41 = vrot.slane %v869_v27, %v876_v60  ;;  %v873_v49 = vcombine.high %v869_v27, %v869_v27 }
 0x1b4   :  { %924 = vadd.xlane.f32.xlu1 %v915_v14  ;;  %v917_v40 = vmul.f32 %v889_v26, %v819_v33 }
 0x1b5   :  { %v920_v58 = vmul.f32 %v901_v38, %v822_v51  ;;  %v919_v59 = vmul.f32 %v897_v41, %v821_v50  ;;  %v905_v0 = vrot.slane %v873_v49, %v876_v60 }
 0x1b6   :  { %926 = vadd.xlane.f32.xlu0 %v916_v23 }
 0x1b7   :  { %v921_v5 = vmul.f32 %v905_v0, %v823_v1 }
 0x1b8   :  { %930 = vadd.xlane.f32.xlu1 %v918_v36 }
 0x1ba   :  { %928 = vadd.xlane.f32.xlu0 %v917_v40 }
 0x1bc   :  { %934 = vadd.xlane.f32.xlu1 %v920_v58 }
 0x1be   :  { %932 = vadd.xlane.f32.xlu0 %v919_v59 }
 0x1c2   :  { %936 = vadd.xlane.f32.xlu0 %v921_v5 }
 0x23f   :  { %v2293_v6 = vpop.xlane.xlu0 %922 }
 0x240   :  { %v1269_v9 = vmul.f32 -1.442695, %v2293_v6  ;;  %v954_v28 = vand.u32 2147483647, %v2293_v6 }
 0x241   :  { %v2295_v8 = vpop.xlane.xlu1 %924 }
 0x242   :  { %v1270_v12 = vmul.f32 -1.442695, %v2295_v8  ;;  %v955_v39 = vand.u32 2147483647, %v2295_v8  ;;  %v962_v47 = vsub.f32 0.0, %v954_v28 }
 0x243   :  { %v2299_v13 = vpop.xlane.xlu0 %926 }
 0x244   :  { %1753 = vpow2.f32 %v1270_v12  ;;  %v1271_v11 = vmul.f32 -1.442695, %v2299_v13  ;;  %v956_v45 = vand.u32 2147483647, %v2299_v13  ;;  %v963_v48 = vsub.f32 0.0, %v955_v39 }
 0x245   :  { %v2302_v16 = vpop.xlane.xlu1 %930  ;;  %1755 = vpow2.f32 %v1269_v9  ;;  %v970_v57 = vmul.f32 1.442695, %v962_v47 }
 0x246   :  { %1757 = vpow2.f32 %v1271_v11  ;;  %v1273_v42 = vmul.f32 -1.442695, %v2302_v16  ;;  %v964_v54 = vsub.f32 0.0, %v956_v45  ;;  %v972_v61 = vmul.f32 1.442695, %v963_v48 }
 0x247   :  { %v2305_v32 = vpop.xlane.xlu0 %928  ;;  %v958_v21 = vand.u32 2147483647, %v2302_v16 }
 0x248   :  { %v1272_v3 = vmul.f32 -1.442695, %v2305_v32  ;;  %v957_v55 = vand.u32 2147483647, %v2305_v32  ;;  %v974_v4 = vmul.f32 1.442695, %v964_v54 }
 0x249   :  { %v2311_v46 = vpop.xlane.xlu1 %934  ;;  %v966_v18 = vsub.f32 0.0, %v958_v21 }
 0x24a   :  { %1759 = vpow2.f32 %v1272_v3  ;;  %v1275_v53 = vmul.f32 -1.442695, %v2311_v46  ;;  %v965_v7 = vsub.f32 0.0, %v957_v55  ;;  %v960_v35 = vand.u32 2147483647, %v2311_v46 }
 0x24b   :  { %1761 = vpow2.f32 %v1273_v42  ;;  %v2315_v62 = vpop.xlane.xlu0 %932  ;;  %v978_v33 = vmul.f32 1.442695, %v966_v18  ;;  %v939_v18 = vsub.f32 0.0, %v2295_v8  ;;  %v941_v8 = vsub.f32 0.0, %v2305_v32 }
 0x24c   :  { %1763 = vpow2.f32 %v1275_v53  ;;  %v959_v15 = vand.u32 2147483647, %v2315_v62  ;;  %v976_v25 = vmul.f32 1.442695, %v965_v7  ;;  %v1274_v14 = vmul.f32 -1.442695, %v2315_v62 }
 0x24d   :  { %1765 = vpow2.f32 %v970_v57  ;;  %v968_v23 = vsub.f32 0.0, %v960_v35  ;;  %v944_v32 = vsub.f32 0.0, %v2311_v46 }
 0x24e   :  { %v1754_v56 = vpop.eup %1753  ;;  %1767 = vpow2.f32 %v972_v61  ;;  %v967_v37 = vsub.f32 0.0, %v959_v15 }
 0x24f   :  { %v1756_v60 = vpop.eup %1755  ;;  %v1043_v2 = vadd.f32 1.0, %v1754_v56  ;;  %v2319_v29 = vpop.xlane.xlu0 %936  ;;  %v982_v41 = vmul.f32 1.442695, %v968_v23 }
 0x250   :  { %v1758_v63 = vpop.eup %1757  ;;  %v1042_v10 = vadd.f32 1.0, %v1756_v60  ;;  %v961_v19 = vand.u32 2147483647, %v2319_v29  ;;  %v980_v26 = vmul.f32 1.442695, %v967_v37 }
 0x251   :  { %v1044_v17 = vadd.f32 1.0, %v1758_v63  ;;  %1769 = vrcp.f32 %v1043_v2  ;;  %v1276_v50 = vmul.f32 -1.442695, %v2319_v29 }
 0x252   :  { %1771 = vpow2.f32 %v974_v4  ;;  %v969_v34 = vsub.f32 0.0, %v961_v19 }
 0x253   :  { %1773 = vrcp.f32 %v1042_v10 }
 0x254   :  { %v1760_v24 = vpop.eup %1759  ;;  %1775 = vrcp.f32 %v1044_v17  ;;  %v984_v52 = vmul.f32 1.442695, %v969_v34  ;;  %v940_v34 = vsub.f32 0.0, %v2299_v13 }
 0x255   :  { %v1762_v30 = vpop.eup %1761  ;;  %v1045_v31 = vadd.f32 1.0, %v1760_v24 }
 0x256   :  { %v1046_v20 = vadd.f32 1.0, %v1762_v30  ;;  %v1764_v22 = vpop.eup %1763  ;;  %v948_v13 = vmax.f32 %v940_v34, 0.0 }
 0x257   :  { %1777 = vrcp.f32 %v1045_v31  ;;  %v1766_v27 = vpop.eup %1765  ;;  %v1048_v38 = vadd.f32 1.0, %v1764_v22 }
 0x258   :  { %1779 = vpow2.f32 %v976_v25  ;;  %v1768_v36 = vpop.eup %1767  ;;  %v986_v59 = vadd.f32 1.0, %v1766_v27 }
 0x259   :  { %1781 = vpow2.f32 %v1274_v14  ;;  %v987_v5 = vadd.f32 1.0, %v1768_v36  ;;  %v938_v14 = vsub.f32 0.0, %v2293_v6 }
 0x25a   :  { %1783 = vrcp.f32 %v1046_v20 }
 0x25b   :  { %v1770_v40 = vpop.eup %1769  ;;  %1785 = vpow2.f32 %v980_v26 }
 0x25c   :  { %v1772_v49 = vpop.eup %1771  ;;  %1787 = vpow2.f32 %v978_v33  ;;  %v1067_v0 = vsub.f32 1.0, %v1770_v40  ;;  %v946_v40 = vmax.f32 %v938_v14, 0.0 }
 0x25d   :  { %v1774_v51 = vpop.eup %1773  ;;  %1789 = vrcp.f32 %v1048_v38  ;;  %v988_v11 = vadd.f32 1.0, %v1772_v49 }
 0x25e   :  { %v1776_v58 = vpop.eup %1775  ;;  %1791 = vpow2.f32 %v982_v41  ;;  %v1066_v12 = vsub.f32 1.0, %v1774_v51  ;;  %v1075_v42 = vadd.f32 0.001, %v1067_v0  ;;  %v947_v41 = vmax.f32 %v939_v18, 0.0 }
 0x25f   :  { %1793 = vpow2.f32 %v1276_v50  ;;  %v1068_v28 = vsub.f32 1.0, %v1776_v58  ;;  %v2331_v0 = vsub.s32 %v2273_v44, %v2271_v43 }
 0x260   :  { %1795 = vpow2.f32 %v984_v52  ;;  %v1074_v53 = vadd.f32 0.001, %v1066_v12 }
 0x261   :  { %v1778_v1 = vpop.eup %1777  ;;  %1797 = vlog2.f32 %v986_v59  ;;  %v1076_v55 = vadd.f32 0.001, %v1068_v28 }
 0x262   :  { %v1780_v9 = vpop.eup %1779  ;;  %v1069_v3 = vsub.f32 1.0, %v1778_v1  ;;  %1799 = vlog2.f32 %v987_v5 }
 0x263   :  { %v1782_v39 = vpop.eup %1781  ;;  %v989_v45 = vadd.f32 1.0, %v1780_v9  ;;  %1801 = vlog2.f32 %v988_v11  ;;  %v942_v11 = vsub.f32 0.0, %v2302_v16 }
 0x264   :  { %v1047_v47 = vadd.f32 1.0, %v1782_v39  ;;  %v1784_v48 = vpop.eup %1783  ;;  %v1077_v56 = vadd.f32 0.001, %v1069_v3  ;;  %v943_v3 = vsub.f32 0.0, %v2315_v62 }
 0x265   :  { %v1786_v54 = vpop.eup %1785  ;;  %v1070_v60 = vsub.f32 1.0, %v1784_v48 }
 0x266   :  { %1803 = vrcp.f32 %v1047_v47  ;;  %v1788_v57 = vpop.eup %1787  ;;  %v991_v63 = vadd.f32 1.0, %v1786_v54 }
 0x267   :  { %1805 = vlog2.f32 %v1075_v42  ;;  %v1790_v61 = vpop.eup %1789  ;;  %v990_v7 = vadd.f32 1.0, %v1788_v57  ;;  %v1078_v15 = vadd.f32 0.001, %v1070_v60  ;;  %v949_v42 = vmax.f32 %v941_v8, 0.0 }
 0x268   :  { %1807 = vlog2.f32 %v989_v45  ;;  %v1792_v2 = vpop.eup %1791  ;;  %v1072_v17 = vsub.f32 1.0, %v1790_v61 }
 0x269   :  { %1809 = vlog2.f32 %v1074_v53  ;;  %v1794_v4 = vpop.eup %1793  ;;  %v992_v30 = vadd.f32 1.0, %v1792_v2  ;;  %v952_v2 = vmax.f32 %v944_v32, 0.0 }
 0x26a   :  { %1811 = vlog2.f32 %v1076_v55  ;;  %v1796_v10 = vpop.eup %1795  ;;  %v1049_v21 = vadd.f32 1.0, %v1794_v4  ;;  %v1080_v19 = vadd.f32 0.001, %v1072_v17 }
 0x26b   :  { %1813 = vlog2.f32 %v1077_v56  ;;  %v1798_v24 = vpop.eup %1797  ;;  %v993_v35 = vadd.f32 1.0, %v1796_v10  ;;  %v951_v10 = vmax.f32 %v943_v3, 0.0 }
 0x26c   :  { %1815 = vlog2.f32 %v991_v63  ;;  %v1800_v25 = vpop.eup %1799  ;;  %v995_v26 = vmul.f32 0.6931472, %v1798_v24  ;;  %v950_v63 = vmax.f32 %v942_v11, 0.0 }
 0x26d   :  { %1817 = vrcp.f32 %v1049_v21  ;;  %v1802_v31 = vpop.eup %1801  ;;  %v997_v27 = vmul.f32 0.6931472, %v1800_v25  ;;  %v945_v25 = vsub.f32 0.0, %v2319_v29 }
 0x26e   :  { %1819 = vlog2.f32 %v990_v7  ;;  %v1010_v50 = vadd.f32 %v995_v26, %v946_v40  ;;  %v999_v58 = vmul.f32 0.6931472, %v1802_v31 }
 0x26f   :  { %1821 = vlog2.f32 %v1078_v15  ;;  %v1011_v52 = vadd.f32 %v997_v27, %v947_v41 }
 0x270   :  { %v1804_v37 = vpop.eup %1803  ;;  %1823 = vlog2.f32 %v992_v30  ;;  %v1107_v43 = vmul.f32 0.03125, %v1010_v50  ;;  %v1012_v54 = vadd.f32 %v999_v58, %v948_v13 }
 0x271   :  { %v1806_v20 = vpop.eup %1805  ;;  %v1071_v22 = vsub.f32 1.0, %v1804_v37  ;;  %1825 = vlog2.f32 %v993_v35  ;;  %v1108_v53 = vmul.f32 0.03125, %v1011_v52 }
 0x272   :  { %v1808_v23 = vpop.eup %1807  ;;  %v1085_v49 = vmul.f32 0.6931472, %v1806_v20  ;;  %1827 = vlog2.f32 %v1080_v19  ;;  %v1134_v21 = vrot.slane %v1107_v43, %v2331_v0  ;;  %v1109_v24 = vmul.f32 0.03125, %v1012_v54 }
 0x273   :  { %v1810_v33 = vpop.eup %1809  ;;  %v1079_v36 = vadd.f32 0.001, %v1071_v22  ;;  %v1001_v5 = vmul.f32 0.6931472, %v1808_v23  ;;  %v1138_v31 = vrot.slane %v1108_v53, %v2331_v0 }
 0x274   :  { %v1812_v38 = vpop.eup %1811  ;;  %v1083_v51 = vmul.f32 0.6931472, %v1810_v33  ;;  %v1099_v12 = vsub.f32 0.0, %v1085_v49 }
 0x275   :  { %v1814_v6 = vpop.eup %1813  ;;  %1829 = vlog2.f32 %v1079_v36  ;;  %v1087_v1 = vmul.f32 0.6931472, %v1812_v38  ;;  %v1013_v56 = vadd.f32 %v1001_v5, %v949_v42  ;;  %v1142_v36 = vrot.slane %v1109_v24, %v2331_v0 }
 0x276   :  { %v1816_v59 = vpop.eup %1815  ;;  %v1089_v28 = vmul.f32 0.6931472, %v1814_v6  ;;  %v1098_v48 = vsub.f32 0.0, %v1083_v51  ;;  %v1116_v61 = vmul.f32 0.03125, %v1099_v12  ;;  %v953_v38 = vmax.f32 %v945_v25, 0.0 }
 0x277   :  { %v1818_v9 = vpop.eup %1817  ;;  %v1100_v55 = vsub.f32 0.0, %v1087_v1  ;;  %v1005_v57 = vmul.f32 0.6931472, %v1816_v59  ;;  %v1110_v37 = vmul.f32 0.03125, %v1013_v56  ;;  %v1164_v40 = vsel %vm1163_vm11, %v1138_v31, %v1134_v21 }
 0x278   :  { %v1820_v39 = vpop.eup %1819  ;;  %v1073_v45 = vsub.f32 1.0, %v1818_v9  ;;  %v1101_v46 = vsub.f32 0.0, %v1089_v28  ;;  %v1115_v17 = vmul.f32 0.03125, %v1098_v48  ;;  %v1193_v18 = vrot.slane %v1116_v61, %v2331_v0 }
 0x279   :  { %v1822_v47 = vpop.eup %1821  ;;  %v1003_v7 = vmul.f32 0.6931472, %v1820_v39  ;;  %v1117_v35 = vmul.f32 0.03125, %v1100_v55  ;;  %v1015_v14 = vadd.f32 %v1005_v57, %v951_v10  ;;  %v1146_v49 = vrot.slane %v1110_v37, %v2331_v0 }
 0x27a   :  { %v1081_v60 = vadd.f32 0.001, %v1073_v45  ;;  %v1824_v16 = vpop.eup %1823  ;;  %v1091_v62 = vmul.f32 0.6931472, %v1822_v47  ;;  %v1118_v19 = vmul.f32 0.03125, %v1101_v46  ;;  %v1189_v34 = vrot.slane %v1115_v17, %v2331_v0 }
 0x27b   :  { %v1826_v4 = vpop.eup %1825  ;;  %v1014_v23 = vadd.f32 %v1003_v7, %v950_v63  ;;  %v1007_v27 = vmul.f32 0.6931472, %v1824_v16  ;;  %v1197_v41 = vrot.slane %v1117_v35, %v2331_v0  ;;  %v1112_v6 = vmul.f32 0.03125, %v1015_v14 }
 0x27c   :  { %1831 = vlog2.f32 %v1081_v60  ;;  %v1828_v15 = vpop.eup %1827  ;;  %v1009_v22 = vmul.f32 0.6931472, %v1826_v4  ;;  %v1102_v26 = vsub.f32 0.0, %v1091_v62  ;;  %v1201_v8 = vrot.slane %v1118_v19, %v2331_v0 }
 0x27d   :  { %v1095_v33 = vmul.f32 0.6931472, %v1828_v15  ;;  %v1218_v52 = vsel %vm1163_vm11, %v1193_v18, %v1189_v34  ;;  %v1111_v58 = vmul.f32 0.03125, %v1014_v23  ;;  %v1016_v13 = vadd.f32 %v1007_v27, %v952_v2 }
 0x27e   :  { %v1017_v50 = vadd.f32 %v1009_v22, %v953_v38  ;;  %v1119_v59 = vmul.f32 0.03125, %v1102_v26  ;;  %v1166_v5 = vsel %vm1165_vm12, %v1142_v36, %v1164_v40  ;;  %v1154_v12 = vrot.slane %v1112_v6, %v2331_v0 }
 0x27f   :  { %v1830_v30 = vpop.eup %1829  ;;  %v1104_v1 = vsub.f32 0.0, %v1095_v33  ;;  %v1168_v11 = vsel %vm1167_vm13, %v1146_v49, %v1166_v5  ;;  %v1219_v28 = vsel %vm1165_vm12, %v1197_v41, %v1218_v52  ;;  %v1150_v45 = vrot.slane %v1111_v58, %v2331_v0 }
 0x280   :  { %v1093_v20 = vmul.f32 0.6931472, %v1830_v30  ;;  %v1114_v32 = vmul.f32 0.03125, %v1017_v50  ;;  %v1220_v3 = vsel %vm1167_vm13, %v1201_v8, %v1219_v28  ;;  %v1113_v47 = vmul.f32 0.03125, %v1016_v13 }
 0x281   :  { %v1121_v48 = vmul.f32 0.03125, %v1104_v1  ;;  %v1205_v43 = vrot.slane %v1119_v59, %v2331_v0  ;;  %v1170_v54 = vsel %vm1169_vm14, %v1150_v45, %v1168_v11 }
 0x282   :  { %v1103_v29 = vsub.f32 0.0, %v1093_v20  ;;  %v1162_v56 = vrot.slane %v1114_v32, %v2331_v0  ;;  %v1172_v60 = vsel %vm1171_vm15, %v1154_v12, %v1170_v54  ;;  %v1158_v61 = vrot.slane %v1113_v47, %v2331_v0 }
 0x283   :  { %v1221_v55 = vsel %vm1169_vm14, %v1205_v43, %v1220_v3  ;;  %v1213_v63 = vrot.slane %v1121_v48, %v2331_v0 }
 0x284   :  { %v1120_v51 = vmul.f32 0.03125, %v1103_v29  ;;  %v1174_v2 = vsel %vm1173_vm0, %v1158_v61, %v1172_v60 }
 0x285   :  { %v1176_v7 = vsel %vm1175_vm1, %v1162_v56, %v1174_v2 }
 0x286   :  { %v1832_v9 = vpop.eup %1831  ;;  %v1209_v42 = vrot.slane %v1120_v51, %v2331_v0 }
 0x287   :  { %v1097_v39 = vmul.f32 0.6931472, %v1832_v9 }
 0x288   :  { %v1222_v16 = vsel %vm1171_vm15, %v1209_v42, %v1221_v55 }
 0x289   :  { %v1105_v53 = vsub.f32 0.0, %v1097_v39  ;;  %v1223_v4 = vsel %vm1173_vm0, %v1213_v63, %v1222_v16 }
 0x28b   :  { %v1122_v57 = vmul.f32 0.03125, %v1105_v53 }
 0x28d   :  { %v1217_v46 = vrot.slane %v1122_v57, %v2331_v0 }
 0x28f   :  { %v1224_v62 = vsel %vm1175_vm1, %v1217_v46, %v1223_v4 }
 0x290   :  { %v1226_v10 = vsel %vm1106_vm2, %v1176_v7, %v1224_v62 }
 0x291   :  { %v1228_v15 = vsel %vm1227_vm3, %v1226_v10, 0.0 }
 0x292   :  { %1229 = vadd.xlane.f32.xlu1 %v1228_v15 }
 0x31f   :  { %v1230_v17 = vpop.xlane.xlu1 %1229 }
 0x320   :  { %v1231_v21 = vrot.slane %v1230_v17, 4 }
 0x322   :  { %v1232_v24 = vadd.f32 %v1231_v21, %v1230_v17 }
 0x324   :  { %v1233_v25 = vrot.slane %v1232_v24, 2 }
 0x326   :  { %v1234_v30 = vadd.f32 %v1233_v25, %v1232_v24 }
 0x328   :  { %v1235_v31 = vrot.slane %v1234_v30, 1 }
 0x32a   :  { %v1236_v35 = vadd.f32 %v1235_v31, %v1234_v30 }
 0x32c   :  { %1742 = vpush %v1236_v35 }
 0x35d   :  { %s1743_s1 = spop %1742 }
 0x35e   :  { %1239 = sst [smem:[#allocation6]] %s1743_s1 }
 0x35f   :  { %1854 = shalt.err (!%p1851_p7)
}
 0x360   :  { %s1865_s23 = smov [#allocation6]  }
 0x361   :  { %1247 = dma.smem_to_hbm %s1865_s23, 16, %s2380_s4, [#allocation4]  }
 0x362   :  { %1857 = dma.done.wait [#allocation4], 16  }
 0x363   :  { %1858 = vsyncadd [#allocation4], 4294967280 }
 0x364   :  { %1251 = sfence }
 0x365   :  { %1252 = vsyncpa [#allocation4], 1 }
 0x366   :  { %1253 = vsyncpa [#allocation5], 1 }

</bundles_post_ra>
